<compile_context>
chip_gen: v6e
topology: v6e:2x2x1
jax: 0.10.0
libtpu: 0.0.40
codegen_flags: <defaults>
</compile_context>

<pallas_src>
import jax
import jax.numpy as jnp
from jax import lax
from jax.experimental import pallas as pl
from jax.experimental.pallas import tpu as pltpu

EPS = 1e-8

# Budget for the 4 live block buffers (2 input + 2 output, double-buffered).
_BUFFER_BUDGET_BYTES = 16 * 1024 * 1024
_VMEM_LIMIT_BYTES = 32 * 1024 * 1024
_MAX_LANES = 2048  # 512-2048 lanes ~ 85%+ of HBM roofline for streaming


def _pixelnorm_kernel(x_ref, o_ref):
    # x_ref / o_ref: (1, C, T_HW) in VMEM
    x = x_ref[...]                                         # native dtype
    xf = x.astype(jnp.float32)                             # no-op for f32 inputs
    ms = jnp.mean(xf * xf, axis=1, keepdims=True)          # (1, 1, T_HW) f32
    scale = lax.rsqrt(ms + EPS)                            # EUP rsqrt (exact)
    o_ref[...] = (xf * scale).astype(o_ref.dtype)          # scale in f32, cast once


def _round_up(v, m):
    return ((v + m - 1) // m) * m


def _choose_tile(C, HW, itemsize):
    """Pick a lane-tile size T_HW (multiple of 128) and the padded HW extent."""
    hw128 = _round_up(HW, 128)
    # 4 live buffers of shape (1, C, T_HW) must fit the budget.
    max_lanes = _BUFFER_BUDGET_BYTES // (4 * C * itemsize)
    max_lanes = max(128, (max_lanes // 128) * 128)
    t_hw = min(_MAX_LANES, hw128, max_lanes)
    hw_pad = _round_up(HW, t_hw)
    return t_hw, hw_pad


def pixel_norm(x):
    """x: (N, C, H, W) float array -> same shape/dtype."""
    N, C, H, W = x.shape
    HW = H * W
    itemsize = jnp.dtype(x.dtype).itemsize

    t_hw, hw_pad = _choose_tile(C, HW, itemsize)

    x2 = x.reshape(N, C, HW)
    if hw_pad != HW:
        # Zero padding is safe: the channel mean is independent per HW column,
        # and padded columns (0 * rsqrt(eps)) stay finite; they are sliced off.
        x2 = jnp.pad(x2, ((0, 0), (0, 0), (0, hw_pad - HW)))

    grid = (N, hw_pad // t_hw)

    out = pl.pallas_call(
        _pixelnorm_kernel,
        out_shape=jax.ShapeDtypeStruct((N, C, hw_pad), x.dtype),
        grid_spec=pltpu.PrefetchScalarGridSpec(
            num_scalar_prefetch=0,
            grid=grid,
            in_specs=[pl.BlockSpec((1, C, t_hw), lambda n, h: (n, 0, h))],
            out_specs=pl.BlockSpec((1, C, t_hw), lambda n, h: (n, 0, h)),
        ),
        compiler_params=pltpu.CompilerParams(
            dimension_semantics=("parallel", "parallel"),
            vmem_limit_bytes=_VMEM_LIMIT_BYTES,
        ),
    )(x2)

    if hw_pad != HW:
        out = out[:, :, :HW]
    return out.reshape(N, C, H, W)


if __name__ == "__main__":
    key = jax.random.PRNGKey(0)
    x = jax.random.normal(key, (2, 4, 16, 16), dtype=jnp.float32)

    y = pixel_norm(x)
    jax.block_until_ready(y)

    # Reference check in plain JAX (same math as the PyTorch module).
    ref = x / jnp.sqrt(jnp.mean(x * x, axis=1, keepdims=True) + EPS)
    assert y.shape == x.shape and y.dtype == x.dtype
    assert jnp.allclose(y, ref, atol=1e-5, rtol=1e-5)

    print("KERNEL_OK")
</pallas_src>

<mosaic_0001>
module attributes {stable_mosaic.version = 11 : i64} {
  func.func @_pixelnorm_kernel(%arg0: i32, %arg1: i32, %arg2: memref<1x4x256xf32, #tpu.memory_space<vmem>>, %arg3: memref<1x4x256xf32, #tpu.memory_space<vmem>>) attributes {dimension_semantics = [#tpu.dimension_semantics<parallel>, #tpu.dimension_semantics<parallel>], iteration_bounds = array<i64: 2, 1>, scalar_prefetch = 0 : i64, scratch_operands = 0 : i64, tpu.core_type = #tpu.core_type<tc>, window_params = [{transform_indices = @transform_0, window_bounds = array<i64: 1, 4, 256>}, {transform_indices = @transform_1, window_bounds = array<i64: 1, 4, 256>}]} {
    %c0 = arith.constant 0 : index
    %c0_0 = arith.constant 0 : index
    %c0_1 = arith.constant 0 : index
    %0 = vector.load %arg2[%c0, %c0_0, %c0_1] : memref<1x4x256xf32, #tpu.memory_space<vmem>>, vector<1x4x256xf32>
    %1 = arith.mulf %0, %0 : vector<1x4x256xf32>
    %cst = arith.constant dense<0.000000e+00> : vector<1x256xf32>
    %2 = vector.multi_reduction <add>, %1, %cst [1] : vector<1x4x256xf32> to vector<1x256xf32>
    %3 = vector.shape_cast %2 : vector<1x256xf32> to vector<1x1x256xf32>
    %cst_2 = arith.constant 4.000000e+00 : f32
    %4 = vector.broadcast %cst_2 : f32 to vector<1x1x256xf32>
    %5 = arith.divf %3, %4 : vector<1x1x256xf32>
    %cst_3 = arith.constant 9.99999993E-9 : f32
    %6 = vector.broadcast %cst_3 : f32 to vector<1x1x256xf32>
    %7 = arith.addf %5, %6 : vector<1x1x256xf32>
    %8 = math.rsqrt %7 : vector<1x1x256xf32>
    %9 = vector.broadcast %8 : vector<1x1x256xf32> to vector<1x4x256xf32>
    %10 = arith.mulf %0, %9 : vector<1x4x256xf32>
    %c0_4 = arith.constant 0 : index
    %c0_5 = arith.constant 0 : index
    %c0_6 = arith.constant 0 : index
    %11 = vector.load %arg3[%c0_4, %c0_5, %c0_6] : memref<1x4x256xf32, #tpu.memory_space<vmem>>, vector<1x4x256xf32>
    tpu.vector_store %arg3[%c0_4, %c0_5, %c0_6], %10 {strides = array<i32>} : memref<1x4x256xf32, #tpu.memory_space<vmem>>, vector<1x4x256xf32>,
    return
  }
  func.func @transform_0(%arg0: i32, %arg1: i32) -> (i32, i32, i32) {
    %c0_i32 = arith.constant 0 : i32
    %c0_i32_0 = arith.constant 0 : i32
    return %arg0, %c0_i32, %arg1 : i32, i32, i32
  }
  func.func @transform_1(%arg0: i32, %arg1: i32) -> (i32, i32, i32) {
    %c0_i32 = arith.constant 0 : i32
    %c0_i32_0 = arith.constant 0 : i32
    return %arg0, %c0_i32, %arg1 : i32, i32, i32
  }
}

</mosaic_0001>

<bundles_post_ra>
// kernel: tpu_custom_call.1
= control target key start
LH: loop header
LB: loop body
LE: loop exit
PB: predicated region body
PF: predicated region fallthrough
CT: control target
= control target key end

     0   :  { %6 = vsyncpa [#allocation3], 0  ;;  %s630_s0 = inlined_call_operand.hbm [shape: f32[2,4,256], index: 0, kind: input, shape index: {}]   ;;  %s631_s1 = inlined_call_operand.hbm [shape: f32[2,4,256], index: 1, kind: output, shape index: {}]  }
   0x1   :  { %8 = vsyncpa [#allocation3 + $0x1], 0 }
   0x2   :  { %9 = vsyncpa [#allocation4], 0 }
   0x3   :  { %11 = vsyncpa [#allocation4 + $0x1], 0  ;;  %s492_s6 = smov 0   ;;  %s494_s7 = smov 0  }
   0x4   :  { %s496_s8 = smov 0   ;;  %s498_s9 = smov 0  }
   0x5   :  { %s500_s10 = smov 0   ;;  %s502_s11 = smov 0  }
   0x6 LB: > { %s287_s12 = sadd.s32 4294967295, %s478_s11   ;;  %s288_s13 = sadd.s32 4294967294, %s478_s11   ;;  %s478_s11 = sphi %s502_s11, %s17_s11   ;;  %s474_s10 = sphi %s500_s10, %s643_s10   ;;  %s470_s9 = sphi %s498_s9, %s642_s9   ;;  %s466_s8 = sphi %s496_s8, %s641_s8   ;;  %s462_s7 = sphi %s494_s7, %s640_s7   ;;  %s458_s6 = sphi %s492_s6, %s639_s6  }
   0x7   : > { %s29_s14 = sadd.s32 1, %s474_s10  ;;  %s38_s15 = sadd.s32 1, %s466_s8 }
   0x8   : > { %p31_p0 = scmp.ge.s32.totalorder %s29_s14, 2  ;;  %p45_p1 = scmp.ne.s32.totalorder %s466_s8, %s462_s7 }
   0x9   : > { %p46_p2 = scmp.eq.s32.totalorder %s478_s11, 0  ;;  %p51_p3 = scmp.ne.s32.totalorder %s462_s7, %s458_s6 }
   0xa   : > { %s645_s14 = smov (%p31_p0, %s29_s14), 0  ;;  %p52_p5 = scmp.eq.s32.totalorder %s287_s12, 0 }
   0xb   : > { %p533_p4 = por %p46_p2, %p45_p1  ;;  %s33_s17 = ssub.s32 %s474_s10, %s645_s14 }
   0xc   : > { %p77_p6 = scmp.eq.s32.totalorder %s287_s12, 1  ;;  %p36_p7 = scmp.eq.s32.totalorder %s33_s17, 0 }
   0xd   : > { %p539_p8 = por %p52_p5, %p51_p3  ;;  %p83_p10 = scmp.eq.s32.totalorder %s288_s13, 1 }
   0xe   : > { %p543_p9 = por %p77_p6, %p45_p1  ;;  %p316_p13 = scmp.lt.s32.totalorder %s478_s11, 2 }
   0xf   : > { %s548_s20 = scalar_select %p36_p7, %s466_s8, %s38_s15  }
  0x10   : > { %p550_p11 = por %p83_p10, %p51_p3  ;;  %s103_s22 = sand.u32 1, %s466_s8  }
  0x11   : > { %s291_s23 = sshll.u32 %s103_s22, 3  ;;  %s302_s24 = sshll.u32 %s474_s10, 7 }
  0x12   : > { %s635_s21 = scalar_select %p550_p11, 1, 0 }
  0x13   : > { %s115_s27 = scalar_lea.hbm %s630_s0, %s302_s24  ;;  %s107_s28 = scalar_lea.vmem [#allocation2], %s291_s23 }
  0x14   : > { %s117_s29 = sshll.u32 %s107_s28, 4  ;;  %p563_p0 = pnand %p316_p13, %p533_p4  ;;  %s118_s29 = int_to_ptr.vmem [resolvable:$true] %s117_s29 }
  0x15   : > { %p294_p1 = scmp.ge.s32.totalorder %s478_s11, 1  ;;  %p122_p2 = scmp.lt.s32.totalorder %s478_s11, 3 }
  0x16   : > { %s104_s2 = scalar_lea.sflag [#allocation3], %s103_s22  ;;  %p372_p3 = pneg %p563_p0 }
  0x17   : > { %s383_s3 = scalar_lea.vmem %s118_s29, 128  ;;  %s480_s4 = smov [#allocation2]  }
  0x18   : > { %p384_p5 = scmp.ne.s32.totalorder %s118_s29, %s383_s3  ;;  %s388_s5 = sshll.u32 %s480_s4, 4  ;;  %s389_s5 = int_to_ptr.vmem [resolvable:$false] %s388_s5 }
  0x19   : > { %s390_s12 = scalar_lea.vmem %s389_s5, 256  ;;  %p391_p10 = scmp.lt.s32.totalorder %s118_s29, %s389_s5 }
  0x1a   : > { %p386_p6 = pnand %p384_p5, %p372_p3  ;;  %p392_p12 = scmp.lt.s32.totalorder %s390_s12, %s383_s3 }
  0x1c   : > { %p387_p7 = pneg %p386_p6  ;;  %p393_p4 = por %p392_p12, %p391_p10 }
  0x1e   : > { %p394_p13 = pnand %p393_p4, %p387_p7 }
  0x20   : > { %397 = shalt.err (!%p394_p13)
}
  0x21   : > { %311 = dma.hbm_to_vmem [thread:$0]  (!%p563_p0), %s115_s27, 128, %s118_s29, %s104_s2  }
  0x22   : > { %p123_p11 = pnand %p294_p1, %p122_p2 }
  0x23   : > { %s578_s13 = sand.u32 (!%p123_p11), 1, %s462_s7  }
  0x24   : > { %126 = sbr.rel (%p123_p11) target bundleno = 95 (0x5f), region = 24  ;;  %s295_s15 = sshll.u32 (!%p123_p11), %s578_s13, 3 }
  0x25   : > { %s129_s16 = scalar_lea.sflag (!%p123_p11), [#allocation3], %s578_s13  ;;  %s132_s17 = scalar_lea.vmem (!%p123_p11), [#allocation2], %s295_s15 }
  0x29   : > { %449 = dma.done.wait (%p539_p8), %s129_s16, 128  }
  0x2a   : > { %451 = vsyncadd (%p539_p8), %s129_s16, 4294967168  ;;  %v153_v0 = vld [vmem:[%s132_s17] sm:$0xff]  ;;  %vm158_vm0 = vcmask 1043456   ;;  %s150_s18 = scalar_lea.vmem [#allocation5], %s295_s15  ;;  %s303_s23 = sshll.u32 %s470_s9, 7 }
  0x2b   : > { %v154_v1 = vmul.f32 %v153_v0, %v153_v0  ;;  %s203_s22 = sshll.u32 %s150_s18, 4  ;;  %s201_s26 = scalar_lea.hbm %s631_s1, %s303_s23  ;;  %s204_s22 = int_to_ptr.vmem [resolvable:$true] %s203_s22 }
  0x2c   : > { %s187_s27 = scalar_lea.sflag [#allocation4], %s578_s13  ;;  %s398_s28 = scalar_lea.vmem %s204_s22, 128 }
  0x2d   : > { %v156_v2 = vcombine.high %v154_v1, %v154_v1  ;;  %v159_v3 = vsel %vm158_vm0, %v154_v1, 0.0  ;;  %p399_p8 = scmp.ne.s32.totalorder %s204_s22, %s398_s28  ;;  %s481_s29 = smov [#allocation5]  }
  0x2e   : > { %v160_v4 = vrot.slane %v159_v3, 4  ;;  %s402_s30 = sshll.u32 %s481_s29, 4  ;;  %s403_s30 = int_to_ptr.vmem [resolvable:$false] %s402_s30 }
  0x2f   : > { %v166_v5 = vsel %vm158_vm0, %v156_v2, 0.0  ;;  %p400_p11 = pnand %p399_p8, %p543_p9  ;;  %s404_s2 = scalar_lea.vmem %s403_s30, 256 }
  0x30   : > { %v161_v6 = vadd.f32 %v160_v4, %v159_v3  ;;  %v167_v7 = vrot.slane %v166_v5, 4  ;;  %p405_p0 = scmp.lt.s32.totalorder %s204_s22, %s403_s30  ;;  %p406_p1 = scmp.lt.s32.totalorder %s404_s2, %s398_s28 }
  0x31   : > { %p401_p12 = pneg %p400_p11 }
  0x32   : > { %v162_v8 = vrot.slane %v161_v6, 2  ;;  %v168_v9 = vadd.f32 %v167_v7, %v166_v5  ;;  %p407_p2 = por %p406_p1, %p405_p0 }
  0x34   : > { %v163_v10 = vadd.f32 %v162_v8, %v161_v6  ;;  %v169_v11 = vrot.slane %v168_v9, 2  ;;  %p408_p3 = pnand %p407_p2, %p401_p12 }
  0x36   : > { %v164_v12 = vrot.slane %v163_v10, 1  ;;  %v170_v13 = vadd.f32 %v169_v11, %v168_v9 }
  0x38   : > { %v165_v14 = vadd.f32 %v164_v12, %v163_v10  ;;  %v171_v15 = vrot.slane %v170_v13, 1 }
  0x3a   : > { %v172_v16 = vadd.f32 %v171_v15, %v170_v13  ;;  %v174_v17 = vmul.f32 0.25, %v165_v14 }
  0x3c   : > { %v175_v18 = vmul.f32 0.25, %v172_v16  ;;  %v176_v19 = vadd.f32 1e-08, %v174_v17 }
  0x3e   : > { %v177_v20 = vadd.f32 1e-08, %v175_v18  ;;  %366 = vrsqrt.f32 %v176_v19 }
  0x40   : > { %368 = vrsqrt.f32 %v177_v20 }
  0x4b   : > { %v367_v21 = vpop.eup %366 }
  0x4d   : > { %v369_v22 = vpop.eup %368 }
  0x4e   : > { %v182_v23 = vcombine.low %v367_v21, %v369_v22 }
  0x50   : > { %v184_v24 = vmul.f32 %v182_v23, %v153_v0 }
  0x52   : > { %185 = vst [vmem:[%s150_s18] sm:$0xff] %v184_v24 }
  0x53   : > { %411 = shalt.err (!%p408_p3)
}
  0x54   : > { %s412_s9 = scalar_lea.hbm %s201_s26, 128  ;;  %s416_s5 = scalar_lea.hbm %s631_s1, 256 }
  0x55   : > { %p413_p5 = scmp.ne.s32.totalorder %s201_s26, %s412_s9  ;;  %p417_p10 = scmp.lt.s32.totalorder %s201_s26, %s631_s1 }
  0x56   : > { %p418_p4 = scmp.lt.s32.totalorder %s416_s5, %s412_s9 }
  0x57   : > { %p414_p6 = pnand %p413_p5, %p543_p9 }
  0x58   : > { %p419_p13 = por %p418_p4, %p417_p10 }
  0x59   : > { %p415_p7 = pneg %p414_p6 }
  0x5b   : > { %p420_p8 = pnand %p419_p13, %p415_p7 }
  0x5d   : > { %423 = shalt.err (!%p420_p8)
}
  0x5e   : > { %306 = dma.vmem_to_hbm [thread:$0]  (%p543_p9), %s204_s22, 128, %s201_s26, %s187_s27  }
  0x5f PF: > { %s215_s15 = sand.u32 1, %s458_s6   ;;  %p637_p11 = scmp.ne.s32.totalorder %s635_s21, 0 }
  0x60   : > { %p638_p12 = scmp.ge.s32.totalorder %s478_s11, 2  ;;  %s216_s16 = scalar_lea.sflag [#allocation4], %s215_s15 }
  0x62   : > { %p313_p0 = pnand %p638_p12, %p637_p11 }
  0x64   : > { %p314_p1 = pneg %p313_p0 }
  0x66   : > { %453 = dma.done.wait (%p314_p1), %s216_s16, 128  }
  0x67   : > { %455 = vsyncadd (%p314_p1), %s216_s16, 4294967168  ;;  %s17_s11 = sadd.s32 1, %s478_s11   ;;  %s639_s6 = smov %s462_s7 }
  0x68   : > { %p14_p2 = scmp.ge.s32.totalorder %s17_s11, 4   ;;  %s640_s7 = smov %s466_s8 }
  0x69   : > { %s641_s8 = smov %s548_s20  ;;  %s642_s9 = smov %s474_s10 }
  0x6a   : > { %s643_s10 = smov %s645_s14  ;;  %16 = sbr.rel (!%p14_p2) target bundleno = 6 (0x6), region = 69 }
  0x6f   :  { %221 = vsyncpa [#allocation3], 1 }
  0x70   :  { %223 = vsyncpa [#allocation3 + $0x1], 1 }
  0x71   :  { %224 = vsyncpa [#allocation4], 1 }
  0x72   :  { %226 = vsyncpa [#allocation4 + $0x1], 1 }

</bundles_post_ra>
